<compile_context>
chip_gen: v7x
topology: tpu7x:2x2x1
jax: 0.10.0
libtpu: 0.0.40
codegen_flags: <defaults>
</compile_context>

<pallas_src>
import math

import jax
import jax.numpy as jnp
from jax import lax
from jax.experimental import pallas as pl
from jax.experimental.pallas import tpu as pltpu

MIN_EXPERT_CAPACITY = 4


# --------------------------------------------------------------------------
# Pallas kernel 1: gating logits + softmax, tiled over token rows (f32).
# TODO(synk): at real E, fuse the top-2 max/argmax reductions here and emit
#             lane-dense packed per-token outputs instead of a (rows, E)
#             tensor whose last dim is only E lanes wide.
# --------------------------------------------------------------------------
def _gate_kernel(x_ref, wg_ref, out_ref):
    # x_ref: (tm, D)   wg_ref: (D, E)   out_ref: (tm, E)
    logits = jnp.dot(x_ref[...], wg_ref[...], preferred_element_type=jnp.float32)
    out_ref[...] = jax.nn.softmax(logits, axis=-1).astype(out_ref.dtype)


def gate_softmax(x, w_gating, *, tm=512):
    B, N, D = x.shape
    E = w_gating.shape[-1]
    BN = B * N
    tm = min(tm, BN)
    bn_pad = tm * pl.cdiv(BN, tm)
    x2d = x.reshape(BN, D).astype(jnp.float32)
    if bn_pad != BN:
        # padded rows produce a uniform softmax and are sliced off below
        x2d = jnp.pad(x2d, ((0, bn_pad - BN), (0, 0)))
    raw = pl.pallas_call(
        _gate_kernel,
        out_shape=jax.ShapeDtypeStruct((bn_pad, E), jnp.float32),
        grid=(bn_pad // tm,),
        in_specs=[pl.BlockSpec((tm, D), lambda i: (i, 0)),
                  pl.BlockSpec((D, E), lambda i: (0, 0))],   # resident weight
        out_specs=pl.BlockSpec((tm, E), lambda i: (i, 0)),
        compiler_params=pltpu.CompilerParams(
            dimension_semantics=("parallel",)),
    )(x2d, w_gating.astype(jnp.float32))
    return raw[:BN].reshape(B, N, E)


# --------------------------------------------------------------------------
# Pallas kernel 2 (fused): per-(batch-block, expert) dispatch + FFN + combine
#   ein[b,c,d] = sum_n dispatch[b,n,c] * x[b,n,d]          (bf16 -> f32 acc)
#   eo[b,c,d]  = relu(ein @ W1[e]) @ W2[e]                  (bf16 -> f32 acc)
#   out[b,n,d]+= sum_c combine[b,n,c] * eo[b,c,d]           (accumulated over e
#                                                            in the resident
#                                                            f32 output block)
# --------------------------------------------------------------------------
def _expert_combine_kernel(disp_ref, comb_ref, x_ref, w1_ref, w2_ref, out_ref):
    # disp_ref/comb_ref: (Bb, N, C) bf16   x_ref: (Bb, N, D) bf16
    # w1_ref: (D, H) bf16   w2_ref: (H, D) bf16   out_ref: (Bb, N, D) f32
    e = pl.program_id(1)

    @pl.when(e == 0)
    def _():
        out_ref[...] = jnp.zeros_like(out_ref)

    disp = disp_ref[...]
    comb = comb_ref[...]
    x = x_ref[...]

    # dispatch: contract over tokens -> (Bb, C, D)
    # TODO(synk): replace this dense 0/1 contraction (and the combine matmul)
    # with a scalar-prefetch row gather/scatter at production N.
    ein = jnp.einsum('bnc,bnd->bcd', disp, x,
                     preferred_element_type=jnp.float32).astype(jnp.bfloat16)
    # expert FFN (ReLU), bf16 operands, f32 MXU accumulation
    h = jnp.maximum(
        jnp.einsum('bcd,dh->bch', ein, w1_ref[...],
                   preferred_element_type=jnp.float32),
        0.0).astype(jnp.bfloat16)                                    # (Bb,C,H)
    eo = jnp.einsum('bch,hd->bcd', h, w2_ref[...],
                    preferred_element_type=jnp.float32).astype(jnp.bfloat16)
    # combine back to token space; accumulate over experts directly into the
    # resident f32 output block (no extra VMEM scratch, no final copy).
    out_ref[...] += jnp.einsum('bnc,bcd->bnd', comb, eo,
                               preferred_element_type=jnp.float32)


def moe_expert_combine(dispatch_benc, combine_benc, x, w1, w2, *, bb=None):
    B, E, N, C = dispatch_benc.shape
    D = x.shape[-1]
    H = w1.shape[-1]
    if bb is None:
        bb = B                     # one batch block -> weights DMA'd E times total
    assert B % bb == 0
    nb = B // bb

    flops = 4 * B * E * C * D * (N + H)                 # dispatch+FFN+combine
    bytes_accessed = (2 * B * E * N * C * 2             # dispatch+combine bf16
                      + B * N * D * 2                   # x bf16 (resident over e)
                      + nb * E * 2 * D * H * 2          # expert weights bf16
                      + B * N * D * 4)                  # f32 output

    return pl.pallas_call(
        _expert_combine_kernel,
        out_shape=jax.ShapeDtypeStruct((B, N, D), jnp.float32),
        grid=(nb, E),
        in_specs=[
            pl.BlockSpec((bb, None, N, C), lambda b, e: (b, e, 0, 0)),
            pl.BlockSpec((bb, None, N, C), lambda b, e: (b, e, 0, 0)),
            pl.BlockSpec((bb, N, D), lambda b, e: (b, 0, 0)),
            pl.BlockSpec((None, D, H), lambda b, e: (e, 0, 0)),
            pl.BlockSpec((None, H, D), lambda b, e: (e, 0, 0)),
        ],
        out_specs=pl.BlockSpec((bb, N, D), lambda b, e: (b, 0, 0)),
        compiler_params=pltpu.CompilerParams(
            dimension_semantics=("parallel", "arbitrary"),
            vmem_limit_bytes=32 * 1024 * 1024),
        cost_estimate=pl.CostEstimate(flops=int(flops), transcendentals=0,
                                      bytes_accessed=int(bytes_accessed)),
    )(dispatch_benc, combine_benc, x, w1, w2)


# --------------------------------------------------------------------------
# Top-2 gating bookkeeping (plain-JAX glue — sequential/elementwise, not a
# matmul hot path).  Mirrors Top2Gating.forward in training mode, but emits
# dispatch/combine in (B, E, N, C_pad) layout with the capacity axis padded
# to a multiple of 128 (lane/MXU alignment; padded columns are provably 0).
# --------------------------------------------------------------------------
def top2_gating(raw_gates, rng_key, *, num_gates, eps=1e-9,
                policy='random', threshold=0.2, capacity_factor=1.25):
    B, group_size, E = raw_gates.shape
    assert E == num_gates

    gate_1 = jnp.max(raw_gates, axis=-1)
    index_1 = jnp.argmax(raw_gates, axis=-1)
    mask_1 = jax.nn.one_hot(index_1, num_gates, dtype=raw_gates.dtype)
    density_1_proxy = raw_gates

    gates_without_top_1 = raw_gates * (1.0 - mask_1)
    gate_2 = jnp.max(gates_without_top_1, axis=-1)
    index_2 = jnp.argmax(gates_without_top_1, axis=-1)
    mask_2 = jax.nn.one_hot(index_2, num_gates, dtype=raw_gates.dtype)

    denom = gate_1 + gate_2 + eps
    gate_1 = gate_1 / denom
    gate_2 = gate_2 / denom

    density_1 = jnp.mean(mask_1, axis=-2)
    density_1_proxy = jnp.mean(density_1_proxy, axis=-2)
    loss = jnp.mean(density_1_proxy * density_1) * float(num_gates ** 2)

    # second-expert 'random' policy (training default)
    probs = jax.random.uniform(rng_key, gate_2.shape, dtype=raw_gates.dtype)
    mask_2 = mask_2 * (probs < gate_2 / max(threshold, eps)).astype(
        mask_2.dtype)[..., None]

    # Real capacity — identical to the PyTorch formula (drop behavior is
    # unchanged).  The capacity axis is padded to a multiple of 128 purely for
    # TPU lane / MXU alignment; slots >= expert_capacity only appear for
    # dropped tokens whose gate*mask factor is exactly zero, so the padded
    # columns of dispatch/combine are all zeros (numerically inert).
    expert_capacity = min(group_size,
                          int(group_size * capacity_factor / num_gates))
    expert_capacity = max(expert_capacity, MIN_EXPERT_CAPACITY)
    cap_f = float(expert_capacity)
    capacity_pad = max(128 * ((expert_capacity + 127) // 128), 128)

    def cumsum_exclusive(t):
        return jnp.cumsum(t, axis=-2) - t

    position_in_expert_1 = cumsum_exclusive(mask_1) * mask_1
    mask_1 = mask_1 * (position_in_expert_1 < cap_f).astype(mask_1.dtype)
    mask_1_count = jnp.sum(mask_1, axis=-2, keepdims=True)
    mask_1_flat = jnp.sum(mask_1, axis=-1)
    position_in_expert_1 = jnp.sum(position_in_expert_1, axis=-1)
    gate_1 = gate_1 * mask_1_flat

    position_in_expert_2 = cumsum_exclusive(mask_2) + mask_1_count
    position_in_expert_2 = position_in_expert_2 * mask_2
    mask_2 = mask_2 * (position_in_expert_2 < cap_f).astype(mask_2.dtype)
    mask_2_flat = jnp.sum(mask_2, axis=-1)
    position_in_expert_2 = jnp.sum(position_in_expert_2, axis=-1)
    gate_2 = gate_2 * mask_2_flat

    # expert one-hots built directly in (B, E, N) so the combine tensor comes
    # out in the kernel-friendly (B, E, N, C) layout with no wrapper transpose
    one_hot_1e = jax.nn.one_hot(index_1, num_gates, dtype=raw_gates.dtype, axis=1)
    one_hot_2e = jax.nn.one_hot(index_2, num_gates, dtype=raw_gates.dtype, axis=1)
    # capacity one-hots: (B, N, C_pad)
    one_hot_1c = jax.nn.one_hot(position_in_expert_1.astype(jnp.int32),
                                capacity_pad, dtype=raw_gates.dtype)
    one_hot_2c = jax.nn.one_hot(position_in_expert_2.astype(jnp.int32),
                                capacity_pad, dtype=raw_gates.dtype)

    combine_tensor = (
        (gate_1 * mask_1_flat)[:, None, :, None]
        * one_hot_1e[..., None] * one_hot_1c[:, None, :, :]
        + (gate_2 * mask_2_flat)[:, None, :, None]
        * one_hot_2e[..., None] * one_hot_2c[:, None, :, :])      # (B, E, N, C)
    dispatch_tensor = (combine_tensor != 0).astype(combine_tensor.dtype)
    return dispatch_tensor, combine_tensor, loss


# --------------------------------------------------------------------------
# MoE forward (Pallas path) and pure-JAX f32 reference
# --------------------------------------------------------------------------
def moe_forward(x, params, rng_key, loss_coef=0.01):
    w_gating, w1, w2 = params['w_gating'], params['w1'], params['w2']
    E = w_gating.shape[-1]
    raw_gates = gate_softmax(x, w_gating)                          # Pallas, f32
    dispatch, combine, loss = top2_gating(raw_gates, rng_key, num_gates=E)
    # expert path runs on bf16 operands with f32 accumulation in the kernel
    out = moe_expert_combine(dispatch.astype(jnp.bfloat16),
                             combine.astype(jnp.bfloat16),
                             x.astype(jnp.bfloat16),
                             w1.astype(jnp.bfloat16),
                             w2.astype(jnp.bfloat16))              # Pallas fused
    return out, loss * loss_coef


def moe_reference(x, params, rng_key, loss_coef=0.01):
    w_gating, w1, w2 = params['w_gating'], params['w1'], params['w2']
    E = w_gating.shape[-1]
    raw_gates = jax.nn.softmax(jnp.einsum('bnd,de->bne', x, w_gating), axis=-1)
    dispatch, combine, loss = top2_gating(raw_gates, rng_key, num_gates=E)
    expert_inputs = jnp.einsum('bnd,benc->ebcd', x, dispatch)
    hidden = jnp.maximum(jnp.einsum('ebcd,edh->ebch', expert_inputs, w1), 0.0)
    expert_outputs = jnp.einsum('ebch,ehd->ebcd', hidden, w2)
    out = jnp.einsum('ebcd,benc->bnd', expert_outputs, combine)
    return out, loss * loss_coef


if __name__ == "__main__":
    # small shapes consistent with MoE(dim=32, num_experts=4): x is (B, N, D)
    B, N, D, E = 2, 32, 32, 4
    H = D * 4  # hidden_dim default = dim * 4

    key = jax.random.PRNGKey(0)
    kx, kg, k1, k2, kp = jax.random.split(key, 5)

    x = jax.random.normal(kx, (B, N, D), dtype=jnp.float32)
    # Top2Gating: w_gating ~ randn(dim, num_gates)
    w_gating = jax.random.normal(kg, (D, E), dtype=jnp.float32)
    # Experts: w1 ~ U(-1/sqrt(H), 1/sqrt(H)), w2 ~ U(-1/sqrt(D), 1/sqrt(D))
    std1 = 1.0 / math.sqrt(H)
    std2 = 1.0 / math.sqrt(D)
    w1 = jax.random.uniform(k1, (E, D, H), minval=-std1, maxval=std1,
                            dtype=jnp.float32)
    w2 = jax.random.uniform(k2, (E, H, D), minval=-std2, maxval=std2,
                            dtype=jnp.float32)
    params = {'w_gating': w_gating, 'w1': w1, 'w2': w2}

    out, loss = moe_forward(x, params, kp)
    out, loss = jax.block_until_ready((out, loss))

    # sanity check against a pure-JAX f32 reference of the same forward
    # (tolerance loosened because the expert path runs bf16 operands with f32
    #  accumulation; a real dispatch/selection bug would miss by >0.1)
    ref_out, ref_loss = moe_reference(x, params, kp)
    assert out.shape == (B, N, D)
    assert jnp.allclose(out, ref_out, atol=3e-2, rtol=3e-2), "output mismatch"
    assert jnp.allclose(loss, ref_loss, atol=1e-5, rtol=1e-5), "loss mismatch"

    print("KERNEL_OK")
</pallas_src>

<mosaic_0001>
module attributes {stable_mosaic.version = 11 : i64} {
  func.func @_gate_kernel(%arg0: i32, %arg1: memref<64x32xf32, #tpu.memory_space<vmem>>, %arg2: memref<32x4xf32, #tpu.memory_space<vmem>>, %arg3: memref<64x4xf32, #tpu.memory_space<vmem>>) attributes {dimension_semantics = [#tpu.dimension_semantics<parallel>], iteration_bounds = array<i64: 1>, scalar_prefetch = 0 : i64, scratch_operands = 0 : i64, tpu.core_type = #tpu.core_type<tc>, window_params = [{transform_indices = @transform_0, window_bounds = array<i64: 64, 32>}, {pipeline_mode = #tpu.pipeline_mode<synchronous>, transform_indices = @transform_1, window_bounds = array<i64: 32, 4>}, {transform_indices = @transform_2, window_bounds = array<i64: 64, 4>}]} {
    %c0 = arith.constant 0 : index
    %c0_0 = arith.constant 0 : index
    %0 = vector.load %arg1[%c0, %c0_0] : memref<64x32xf32, #tpu.memory_space<vmem>>, vector<64x32xf32>
    %c0_1 = arith.constant 0 : index
    %c0_2 = arith.constant 0 : index
    %1 = vector.load %arg2[%c0_1, %c0_2] : memref<32x4xf32, #tpu.memory_space<vmem>>, vector<32x4xf32>
    %cst = arith.constant dense<0.000000e+00> : vector<64x4xf32>
    %2 = tpu.matmul %0, %1, %cst {dimension_numbers = #tpu.dot_dimension_numbers<[1], [0], [0], [1], [0, 0, 1, 1], [], []>} : vector<64x32xf32>, vector<32x4xf32>, vector<64x4xf32> -> vector<64x4xf32>
    %cst_3 = arith.constant dense<0xFF800000> : vector<64xf32>
    %3 = vector.multi_reduction <maximumf>, %2, %cst_3 [1] : vector<64x4xf32> to vector<64xf32>
    %cst_4 = arith.constant 0xFF800000 : f32
    %4 = vector.broadcast %cst_4 : f32 to vector<64xf32>
    %5 = arith.maximumf %4, %3 : vector<64xf32>
    %6 = vector.shape_cast %5 : vector<64xf32> to vector<64x1xf32>
    %7 = vector.broadcast %6 : vector<64x1xf32> to vector<64x4xf32>
    %8 = arith.subf %2, %7 : vector<64x4xf32>
    %9 = math.exp %8 : vector<64x4xf32>
    %cst_5 = arith.constant dense<0.000000e+00> : vector<64xf32>
    %10 = vector.multi_reduction <add>, %9, %cst_5 [1] : vector<64x4xf32> to vector<64xf32>
    %11 = vector.shape_cast %10 : vector<64xf32> to vector<64x1xf32>
    %12 = vector.broadcast %11 : vector<64x1xf32> to vector<64x4xf32>
    %13 = arith.divf %9, %12 : vector<64x4xf32>
    %c0_6 = arith.constant 0 : index
    %c0_7 = arith.constant 0 : index
    %14 = vector.load %arg3[%c0_6, %c0_7] : memref<64x4xf32, #tpu.memory_space<vmem>>, vector<64x4xf32>
    tpu.vector_store %arg3[%c0_6, %c0_7], %13 {strides = array<i32>} : memref<64x4xf32, #tpu.memory_space<vmem>>, vector<64x4xf32>,
    return
  }
  func.func @transform_0(%arg0: i32) -> (i32, i32) {
    %c0_i32 = arith.constant 0 : i32
    %c0_i32_0 = arith.constant 0 : i32
    return %arg0, %c0_i32 : i32, i32
  }
  func.func @transform_1(%arg0: i32) -> (i32, i32) {
    %c0_i32 = arith.constant 0 : i32
    %c0_i32_0 = arith.constant 0 : i32
    %c0_i32_1 = arith.constant 0 : i32
    return %c0_i32, %c0_i32_0 : i32, i32
  }
  func.func @transform_2(%arg0: i32) -> (i32, i32) {
    %c0_i32 = arith.constant 0 : i32
    %c0_i32_0 = arith.constant 0 : i32
    return %arg0, %c0_i32 : i32, i32
  }
}

</mosaic_0001>

<bundles_post_ra>
// kernel: tpu_custom_call.1
= control target key start
LH: loop header
LB: loop body
LE: loop exit
PB: predicated region body
PF: predicated region fallthrough
CT: control target
= control target key end

     0   :  { %vm23_vm0 = vcmask 261120   ;;  %vm153_vm1 = vcmask 31744   ;;  %s445_s1 = inlined_call_operand.vmem [shape: f32[32,4], index: 1, kind: input, shape index: {}]   ;;  %s446_s0 = inlined_call_operand.vmem [shape: f32[64,32], index: 0, kind: input, shape index: {}]   ;;  %s447_s2 = inlined_call_operand.vmem [shape: f32[64,4], index: 2, kind: output, shape index: {}]  }
   0x1   :  { %v19_v0 = vld [vmem:[%s445_s1] sm:$0xff]  ;;  %v20_v1 = vld [vmem:[%s445_s1 + $0x8] sm:$0xff]  ;;  %v21_v2 = vld [vmem:[%s445_s1 + $0x10] sm:$0xff] }
   0x2   :  { %v294_v3 = vpack.c.bf16 %v20_v1, %v19_v0  ;;  %v22_v4 = vld [vmem:[%s445_s1 + $0x18] sm:$0xff]  ;;  %v11_v5 = vld [vmem:[%s446_s0] sm:$0xff]  ;;  %v12_v8 = vld [vmem:[%s446_s0 + $0x8] sm:$0xff] }
   0x3   :  { %v15_v6 = vld [vmem:[%s446_s0 + $0x20] sm:$0xff]  ;;  %v298_v7 = vpack.c.bf16 %v22_v4, %v21_v2  ;;  %282 = vmatprep.mubr.msk.f32.mxu0 %vm23_vm0, %v11_v5  ;;  %v16_v9 = vld [vmem:[%s446_s0 + $0x28] sm:$0xff]  ;;  %v13_v10 = vld [vmem:[%s446_s0 + $0x10] sm:$0xff] }
   0x4   :  { %288 = vmatprep.mubr.msk.f32.mxu1 %vm23_vm0, %v15_v6  ;;  %295 = vmatprep.subr.bf16.mxu0 %v294_v3  ;;  %v17_v11 = vld [vmem:[%s446_s0 + $0x30] sm:$0xff]  ;;  %v14_v12 = vld [vmem:[%s446_s0 + $0x18] sm:$0xff] }
   0x5   :  { %302 = vmatprep.subr.bf16.mxu1 %v294_v3  ;;  %297 = vmatpush3.bf16.msra.mxu0 %v294_v3  ;;  %v18_v13 = vld [vmem:[%s446_s0 + $0x38] sm:$0xff] }
   0x6   :  { %304 = vmatpush3.bf16.msra.mxu1 %v294_v3  ;;  %299 = vmatprep.subr.bf16.mxu0 %v298_v7 }
   0x7   :  { %303 = vmatprep.subr.bf16.mxu1 %v298_v7 }
   0x9   :  { %301 = vmatpush3.bf16.msra.mxu0 %v298_v7 }
   0xa   :  { %305 = vmatpush3.bf16.msra.mxu1 %v298_v7 }
   0xc   :  { %283 = vmatmul.mubr.msk.f32.vlgmr.msra.gmra.mrb[0].mxu0 %vm23_vm0, %v12_v8 }
   0xd   :  { %289 = vmatmul.mubr.msk.f32.vlgmr.msra.gmra.mrb[0].mxu1 %vm23_vm0, %v16_v9  ;;  %285 = vmatprep.mubr.msk.f32.mxu0 %vm23_vm0, %v13_v10 }
   0xe   :  { %291 = vmatprep.mubr.msk.f32.mxu1 %vm23_vm0, %v17_v11 }
  0x10   :  { %286 = vmatmul.mubr.msk.f32.gmra.mrb[2].mxu0 %vm23_vm0, %v14_v12 }
  0x11   :  { %292 = vmatmul.mubr.msk.f32.gmra.mrb[2].mxu1 %vm23_vm0, %v18_v13 }
  0xdf   :  { %v284_v14 = vpop.f32.mrb[0].mxu0 }
  0xe0   :  { %v290_v15 = vpop.f32.mrb[0].mxu1  ;;  %v114_v16 = vpop.f32.mrb[1].mxu0  ;;  %v157_v18 = vsel %vm153_vm1, %v284_v14, -inf }
  0xe1   :  { %v169_v17 = vsel %vm153_vm1, %v290_v15, -inf  ;;  %v134_v19 = vpop.f32.mrb[1].mxu1  ;;  %158 = vmax.xlane.f32.xlu0 %v157_v18  ;;  %v154_v22 = vsel %vm153_vm1, %v114_v16, -inf }
  0xe2   :  { %170 = vmax.xlane.f32.xlu1 %v169_v17  ;;  %v166_v27 = vsel %vm153_vm1, %v134_v19, -inf }
  0xe3   :  { %v287_v20 = vpop.f32.mrb[2].mxu0 }
  0xe4   :  { %v293_v21 = vpop.f32.mrb[2].mxu1  ;;  %v163_v23 = vsel %vm153_vm1, %v287_v20, -inf  ;;  %v124_v24 = vpop.f32.mrb[3].mxu0 }
  0xe5   :  { %v144_v25 = vpop.f32.mrb[3].mxu1  ;;  %155 = vmax.xlane.f32.xlu0 %v154_v22  ;;  %v160_v26 = vsel %vm153_vm1, %v124_v24, -inf  ;;  %v175_v29 = vsel %vm153_vm1, %v293_v21, -inf }
  0xe6   :  { %164 = vmax.xlane.f32.xlu1 %v163_v23  ;;  %v172_v28 = vsel %vm153_vm1, %v144_v25, -inf }
  0xe9   :  { %167 = vmax.xlane.f32.xlu0 %v166_v27 }
  0xea   :  { %161 = vmax.xlane.f32.xlu1 %v160_v26 }
  0xed   :  { %173 = vmax.xlane.f32.xlu0 %v172_v28 }
  0xee   :  { %176 = vmax.xlane.f32.xlu1 %v175_v29 }
 0x16e   :  { %v159_v31 = vpop.xlane.xlu0 %158 }
 0x16f   :  { %v171_v30 = vpop.xlane.xlu1 %170  ;;  %v179_v33 = vsub.f32 %v284_v14, %v159_v31 }
 0x170   :  { %v183_v32 = vsub.f32 %v290_v15, %v171_v30 }
 0x171   :  { %v188_v34 = vmul.f32 1.442695, %v179_v33 }
 0x172   :  { %v196_v35 = vmul.f32 1.442695, %v183_v32  ;;  %v156_v36 = vpop.xlane.xlu0 %155 }
 0x173   :  { %v165_v37 = vpop.xlane.xlu1 %164  ;;  %v178_v38 = vsub.f32 %v114_v16, %v156_v36  ;;  %306 = vpow2.f32 %v188_v34 }
 0x174   :  { %v181_v39 = vsub.f32 %v287_v20, %v165_v37  ;;  %308 = vpow2.f32 %v196_v35 }
 0x175   :  { %v186_v40 = vmul.f32 1.442695, %v178_v38 }
 0x176   :  { %v192_v41 = vmul.f32 1.442695, %v181_v39  ;;  %v168_v42 = vpop.xlane.xlu0 %167 }
 0x177   :  { %v162_v43 = vpop.xlane.xlu1 %161  ;;  %310 = vpow2.f32 %v186_v40  ;;  %v182_v44 = vsub.f32 %v134_v19, %v168_v42 }
 0x178   :  { %v180_v45 = vsub.f32 %v124_v24, %v162_v43  ;;  %312 = vpow2.f32 %v192_v41 }
 0x179   :  { %v194_v46 = vmul.f32 1.442695, %v182_v44 }
 0x17a   :  { %v190_v47 = vmul.f32 1.442695, %v180_v45  ;;  %v174_v48 = vpop.xlane.xlu0 %173 }
 0x17b   :  { %v177_v49 = vpop.xlane.xlu1 %176  ;;  %314 = vpow2.f32 %v194_v46  ;;  %v184_v50 = vsub.f32 %v144_v25, %v174_v48 }
 0x17c   :  { %v185_v51 = vsub.f32 %v293_v21, %v177_v49  ;;  %316 = vpow2.f32 %v190_v47 }
 0x17d   :  { %v198_v52 = vmul.f32 1.442695, %v184_v50  ;;  %v307_v54 = vpop.eup %306 }
 0x17e   :  { %v200_v53 = vmul.f32 1.442695, %v185_v51  ;;  %v205_v55 = vsel %vm153_vm1, %v307_v54, 0.0  ;;  %v309_v56 = vpop.eup %308 }
 0x17f   :  { %206 = vadd.xlane.f32.xlu1 %v205_v55  ;;  %v217_v59 = vsel %vm153_vm1, %v309_v56, 0.0 }
 0x180   :  { %318 = vpow2.f32 %v200_v53 }
 0x181   :  { %v311_v57 = vpop.eup %310  ;;  %320 = vpow2.f32 %v198_v52 }
 0x182   :  { %v202_v58 = vsel %vm153_vm1, %v311_v57, 0.0  ;;  %v313_v60 = vpop.eup %312 }
 0x183   :  { %203 = vadd.xlane.f32.xlu0 %v202_v58  ;;  %218 = vadd.xlane.f32.xlu1 %v217_v59  ;;  %v211_v0 = vsel %vm153_vm1, %v313_v60, 0.0 }
 0x185   :  { %v315_v61 = vpop.eup %314 }
 0x186   :  { %v214_v62 = vsel %vm153_vm1, %v315_v61, 0.0  ;;  %v317_v63 = vpop.eup %316 }
 0x187   :  { %215 = vadd.xlane.f32.xlu0 %v214_v62  ;;  %212 = vadd.xlane.f32.xlu1 %v211_v0  ;;  %v208_v2 = vsel %vm153_vm1, %v317_v63, 0.0 }
 0x18a   :  { %v319_v1 = vpop.eup %318 }
 0x18b   :  { %v321_v3 = vpop.eup %320  ;;  %209 = vadd.xlane.f32.xlu0 %v208_v2  ;;  %v223_v4 = vsel %vm153_vm1, %v319_v1, 0.0 }
 0x18c   :  { %224 = vadd.xlane.f32.xlu1 %v223_v4  ;;  %v220_v5 = vsel %vm153_vm1, %v321_v3, 0.0 }
 0x18f   :  { %221 = vadd.xlane.f32.xlu0 %v220_v5 }
 0x20c   :  { %v207_v6 = vpop.xlane.xlu1 %206 }
 0x20d   :  { %322 = vrcp.f32 %v207_v6 }
 0x210   :  { %v204_v7 = vpop.xlane.xlu0 %203  ;;  %v219_v8 = vpop.xlane.xlu1 %218 }
 0x211   :  { %324 = vrcp.f32 %v204_v7 }
 0x212   :  { %326 = vrcp.f32 %v219_v8 }
 0x214   :  { %v216_v9 = vpop.xlane.xlu0 %215  ;;  %v213_v10 = vpop.xlane.xlu1 %212 }
 0x215   :  { %328 = vrcp.f32 %v216_v9 }
 0x216   :  { %330 = vrcp.f32 %v213_v10 }
 0x217   :  { %v323_v11 = vpop.eup %322 }
 0x218   :  { %v210_v12 = vpop.xlane.xlu0 %209  ;;  %v229_v13 = vmul.f32 %v323_v11, %v307_v54 }
 0x219   :  { %332 = vrcp.f32 %v210_v12  ;;  %v225_v14 = vpop.xlane.xlu1 %224 }
 0x21a   :  { %334 = vrcp.f32 %v225_v14  ;;  %243 = vst.msk [vmem:[%s447_s2 + $0x8] sm:$0xff] %vm153_vm1, %v229_v13 }
 0x21b   :  { %v325_v15 = vpop.eup %324 }
 0x21c   :  { %v327_v16 = vpop.eup %326  ;;  %v227_v17 = vmul.f32 %v325_v15, %v311_v57  ;;  %v222_v18 = vpop.xlane.xlu0 %221 }
 0x21d   :  { %v237_v19 = vmul.f32 %v327_v16, %v309_v56  ;;  %336 = vrcp.f32 %v222_v18 }
 0x21e   :  { %242 = vst.msk [vmem:[%s447_s2] sm:$0xff] %vm153_vm1, %v227_v17 }
 0x21f   :  { %v329_v20 = vpop.eup %328  ;;  %247 = vst.msk [vmem:[%s447_s2 + $0x28] sm:$0xff] %vm153_vm1, %v237_v19 }
 0x220   :  { %v331_v21 = vpop.eup %330  ;;  %v235_v22 = vmul.f32 %v329_v20, %v315_v61 }
 0x221   :  { %v233_v23 = vmul.f32 %v331_v21, %v313_v60 }
 0x222   :  { %246 = vst.msk [vmem:[%s447_s2 + $0x20] sm:$0xff] %vm153_vm1, %v235_v22 }
 0x223   :  { %v333_v24 = vpop.eup %332  ;;  %245 = vst.msk [vmem:[%s447_s2 + $0x18] sm:$0xff] %vm153_vm1, %v233_v23 }
 0x224   :  { %v335_v25 = vpop.eup %334  ;;  %v231_v26 = vmul.f32 %v333_v24, %v317_v63 }
 0x225   :  { %v241_v27 = vmul.f32 %v335_v25, %v319_v1 }
 0x226   :  { %244 = vst.msk [vmem:[%s447_s2 + $0x10] sm:$0xff] %vm153_vm1, %v231_v26 }
 0x227   :  { %v337_v28 = vpop.eup %336  ;;  %249 = vst.msk [vmem:[%s447_s2 + $0x38] sm:$0xff] %vm153_vm1, %v241_v27 }
 0x228   :  { %v239_v29 = vmul.f32 %v337_v28, %v321_v3 }
 0x22a   :  { %248 = vst.msk [vmem:[%s447_s2 + $0x30] sm:$0xff] %vm153_vm1, %v239_v29 }

</bundles_post_ra>
